<compile_context>
chip_gen: v6e
topology: v6e:2x2x1
jax: 0.10.0
libtpu: 0.0.40
codegen_flags: <defaults>
</compile_context>

<pallas_src>
import functools

import jax
import jax.numpy as jnp
from jax import lax
from jax.experimental import pallas as pl
from jax.experimental.pallas import tpu as pltpu


# ----------------------------------------------------------------------------
# Helpers
# ----------------------------------------------------------------------------
def _round_up(x, m):
    return ((x + m - 1) // m) * m


def _pick_tile(dim, prefs):
    """Largest preferred tile that evenly divides `dim`, else the full dim."""
    for p in prefs:
        if dim >= p and dim % p == 0:
            return p
    return dim


# ----------------------------------------------------------------------------
# Pallas kernels
# ----------------------------------------------------------------------------
def _fused_mm_kernel(*refs, relu, has_res):
    """Tiled MXU matmul with fused BN/bias (+ residual add) (+ ReLU) epilogue."""
    if has_res:
        a_ref, b_ref, s_ref, t_ref, r_ref, o_ref, acc_ref = refs
    else:
        a_ref, b_ref, s_ref, t_ref, o_ref, acc_ref = refs

    @pl.when(pl.program_id(2) == 0)
    def _init():
        acc_ref[...] = jnp.zeros_like(acc_ref)

    acc_ref[...] += jnp.dot(a_ref[...], b_ref[...],
                            preferred_element_type=jnp.float32)

    @pl.when(pl.program_id(2) == pl.num_programs(2) - 1)
    def _store():
        y = acc_ref[...] * s_ref[...] + t_ref[...]
        if has_res:
            y = y + r_ref[...].astype(jnp.float32)
        if relu:
            y = jnp.maximum(y, 0.0)
        o_ref[...] = y.astype(o_ref.dtype)


def fused_matmul(a, b, scale, shift, residual=None, relu=False,
                 out_dtype=jnp.bfloat16):
    """out = maybe_relu((a @ b) * scale + shift [+ residual]).

    a: (M, K), b: (K, N) — cast to bf16 for the MXU, f32 accumulation.
    scale/shift: per-output-channel (N,) f32 (BN folded, or ones/bias).
    residual: optional (M, N) tensor added in the epilogue (then ReLU).
    """
    M, K = a.shape
    Kb, N = b.shape
    assert K == Kb
    a = a.astype(jnp.bfloat16)
    b = b.astype(jnp.bfloat16)
    scale = scale.astype(jnp.float32)
    shift = shift.astype(jnp.float32)

    # Tiny, non-8-aligned output channel counts (flow=2, num_classes) are padded
    # once on the (tiny) weight/scale side; everything else stays unpadded.
    n_eff = N
    if N % 8 != 0:
        n_eff = _round_up(N, 128)
        b = jnp.pad(b, ((0, 0), (0, n_eff - N)))
        scale = jnp.pad(scale, (0, n_eff - N))
        shift = jnp.pad(shift, (0, n_eff - N))
        if residual is not None:
            residual = jnp.pad(residual, ((0, 0), (0, n_eff - N)))

    # M tiling: prefer 256/128 tiles; small maps use a single full-M block.
    # Pad M only in the rare huge-and-unaligned fallback.
    m_eff, pad_m = M, 0
    tm = _pick_tile(M, (256, 128))
    if tm == M and M > 2048:
        tm = 256
        pad_m = (-M) % 256
        m_eff = M + pad_m
        a = jnp.pad(a, ((0, pad_m), (0, 0)))
        if residual is not None:
            residual = jnp.pad(residual, ((0, pad_m), (0, 0)))

    tn = _pick_tile(n_eff, (512, 256, 128))
    # Small K -> single resident weight block (fetched once); large K -> 512 tiles.
    tk = K if K <= 2304 else _pick_tile(K, (512, 256, 128))

    scale2 = scale.reshape(1, n_eff)
    shift2 = shift.reshape(1, n_eff)

    has_res = residual is not None
    in_specs = [
        pl.BlockSpec((tm, tk), lambda i, j, k: (i, k)),
        pl.BlockSpec((tk, tn), lambda i, j, k: (k, j)),
        pl.BlockSpec((1, tn), lambda i, j, k: (0, j)),
        pl.BlockSpec((1, tn), lambda i, j, k: (0, j)),
    ]
    args = [a, b, scale2, shift2]
    if has_res:
        in_specs.append(pl.BlockSpec((tm, tn), lambda i, j, k: (i, j)))
        args.append(residual)

    out = pl.pallas_call(
        functools.partial(_fused_mm_kernel, relu=relu, has_res=has_res),
        out_shape=jax.ShapeDtypeStruct((m_eff, n_eff), out_dtype),
        grid_spec=pltpu.PrefetchScalarGridSpec(
            num_scalar_prefetch=0,
            grid=(m_eff // tm, n_eff // tn, K // tk),
            in_specs=in_specs,
            out_specs=pl.BlockSpec((tm, tn), lambda i, j, k: (i, j)),
            scratch_shapes=[pltpu.VMEM((tm, tn), jnp.float32)]),
        compiler_params=pltpu.CompilerParams(
            dimension_semantics=("parallel", "parallel", "arbitrary")),
    )(*args)

    if pad_m or n_eff != N:
        out = out[:M, :N]
    return out


def _add_kernel(x_ref, y_ref, o_ref, *, relu):
    z = x_ref[...].astype(jnp.float32) + y_ref[...].astype(jnp.float32)
    if relu:
        z = jnp.maximum(z, 0.0)
    o_ref[...] = z.astype(o_ref.dtype)


def pallas_add(x2d, y2d, relu=False):
    """Elementwise add (used only for the FAM l + warped merge)."""
    R, C = x2d.shape
    tr = _pick_tile(R, (1024, 512, 256))
    return pl.pallas_call(
        functools.partial(_add_kernel, relu=relu),
        out_shape=jax.ShapeDtypeStruct((R, C), x2d.dtype),
        grid=(R // tr,),
        in_specs=[pl.BlockSpec((tr, C), lambda i: (i, 0)),
                  pl.BlockSpec((tr, C), lambda i: (i, 0))],
        out_specs=pl.BlockSpec((tr, C), lambda i: (i, 0)),
        compiler_params=pltpu.CompilerParams(
            dimension_semantics=("parallel",)),
    )(x2d, y2d)


# ----------------------------------------------------------------------------
# Plain-JAX glue: im2col, pooling, bilinear resize, flow-warp (grid_sample)
# ----------------------------------------------------------------------------
def im2col(x, kh, kw, stride, pad):
    """x: (B, H, W, C) NHWC -> patches (B*Ho*Wo, kh*kw*C) (kept in bf16)."""
    B, H, W, C = x.shape
    if pad > 0:
        x = jnp.pad(x, ((0, 0), (pad, pad), (pad, pad), (0, 0)))
    Ho = (H + 2 * pad - kh) // stride + 1
    Wo = (W + 2 * pad - kw) // stride + 1
    cols = []
    for i in range(kh):
        for j in range(kw):
            cols.append(x[:, i:i + stride * (Ho - 1) + 1:stride,
                          j:j + stride * (Wo - 1) + 1:stride, :])
    patches = jnp.concatenate(cols, axis=-1)
    return patches.reshape(B * Ho * Wo, kh * kw * C), (B, Ho, Wo)


def maxpool2d(x, k, stride, pad):
    return lax.reduce_window(
        x, jnp.array(-jnp.inf, dtype=x.dtype), lax.max,
        window_dimensions=(1, k, k, 1),
        window_strides=(1, stride, stride, 1),
        padding=((0, 0), (pad, pad), (pad, pad), (0, 0)))


def adaptive_avg_pool(x, out_h, out_w):
    # TODO(synk): adaptive pooling (PyTorch floor/ceil bin rule) stays in JAX;
    # bins are tiny (<=6x6) so this is negligible.
    B, H, W, C = x.shape
    rows = []
    for i in range(out_h):
        hs, he = (i * H) // out_h, -(-((i + 1) * H) // out_h)
        cols = []
        for j in range(out_w):
            ws, we = (j * W) // out_w, -(-((j + 1) * W) // out_w)
            cols.append(jnp.mean(x[:, hs:he, ws:we, :], axis=(1, 2)))
        rows.append(jnp.stack(cols, axis=1))
    return jnp.stack(rows, axis=1)


def upsample_bilinear_ac(x, out_h, out_w):
    """F.interpolate(mode='bilinear', align_corners=True), NHWC."""
    B, H, W, C = x.shape
    if (H, W) == (out_h, out_w):
        return x

    def coords(out, inp):
        if out > 1:
            src = jnp.arange(out, dtype=jnp.float32) * ((inp - 1) / (out - 1))
        else:
            src = jnp.zeros((out,), jnp.float32)
        i0 = jnp.clip(jnp.floor(src).astype(jnp.int32), 0, inp - 1)
        i1 = jnp.clip(i0 + 1, 0, inp - 1)
        w1 = src - i0.astype(jnp.float32)
        return i0, i1, 1.0 - w1, w1

    y0, y1, wy0, wy1 = coords(out_h, H)
    x0, x1, wx0, wx1 = coords(out_w, W)
    rows = (x[:, y0, :, :] * wy0[None, :, None, None]
            + x[:, y1, :, :] * wy1[None, :, None, None])
    out = (rows[:, :, x0, :] * wx0[None, None, :, None]
           + rows[:, :, x1, :] * wx1[None, None, :, None])
    return out.astype(x.dtype)


def grid_sample_bilinear(x, grid):
    """F.grid_sample bilinear, zero padding, align_corners=False. NHWC."""
    # TODO(synk): data-dependent gather implemented in plain JAX, not Pallas.
    B, Hin, Win, C = x.shape
    gx, gy = grid[..., 0], grid[..., 1]
    fx = ((gx + 1.0) * Win - 1.0) / 2.0
    fy = ((gy + 1.0) * Hin - 1.0) / 2.0
    x0 = jnp.floor(fx)
    y0 = jnp.floor(fy)
    wx1, wy1 = fx - x0, fy - y0
    wx0, wy0 = 1.0 - wx1, 1.0 - wy1
    x0i, y0i = x0.astype(jnp.int32), y0.astype(jnp.int32)
    x1i, y1i = x0i + 1, y0i + 1

    def sample_one(xb, y0b, y1b, x0b, x1b, wy0b, wy1b, wx0b, wx1b):
        def tap(yi, xi, w):
            m = ((yi >= 0) & (yi < Hin) & (xi >= 0) & (xi < Win)).astype(jnp.float32)
            yc = jnp.clip(yi, 0, Hin - 1)
            xc = jnp.clip(xi, 0, Win - 1)
            return xb[yc, xc].astype(jnp.float32) * (w * m)[..., None]
        return (tap(y0b, x0b, wy0b * wx0b) + tap(y0b, x1b, wy0b * wx1b)
                + tap(y1b, x0b, wy1b * wx0b) + tap(y1b, x1b, wy1b * wx1b))

    return jax.vmap(sample_one)(x, y0i, y1i, x0i, x1i, wy0, wy1, wx0, wx1)


def flow_warp(high, flow, out_h, out_w):
    """SFNet flow-warp: sample `high` with a base grid offset by `flow`."""
    h_grid = jnp.linspace(-1.0, 1.0, out_h)
    w_grid = jnp.linspace(-1.0, 1.0, out_w)
    gx, gy = jnp.meshgrid(w_grid, h_grid, indexing="xy")
    base = jnp.stack([gx, gy], axis=-1)  # (out_h, out_w, 2) = (x, y)
    norm = jnp.array([out_w, out_h], jnp.float32)
    grid = base[None] + flow.astype(jnp.float32) / norm
    return grid_sample_bilinear(high, grid)


# ----------------------------------------------------------------------------
# Deterministic parameter construction
# ----------------------------------------------------------------------------
_BASE_KEY = jax.random.PRNGKey(0)
_KEY_CTR = [0]


def _next_key():
    _KEY_CTR[0] += 1
    return jax.random.fold_in(_BASE_KEY, _KEY_CTR[0])


def make_conv(cin, cout, k, bias=False):
    fan_in = cin * k * k
    w = jax.random.normal(_next_key(), (cout, cin, k, k), jnp.float32)
    w = w * jnp.sqrt(2.0 / fan_in)
    # PyTorch (Cout,Cin,kh,kw) -> matmul weight (kh*kw*Cin, Cout) matching im2col.
    wmat = jnp.transpose(w, (2, 3, 1, 0)).reshape(k * k * cin, cout)
    kdim = k * k * cin
    kp = _round_up(kdim, 16)  # bf16 sublane-packing alignment (stem 7x7x3 only)
    if kp != kdim:
        wmat = jnp.pad(wmat, ((0, kp - kdim), (0, 0)))
    p = {"wmat": wmat.astype(jnp.bfloat16), "k": k, "kdim": kdim}
    if bias:
        p["bias"] = 0.02 * jax.random.normal(_next_key(), (cout,), jnp.float32)
    return p


def make_bn(c):
    idx = jnp.arange(c, dtype=jnp.float32)
    gamma = 1.0 + 0.1 * jnp.cos(idx)
    beta = 0.05 * jnp.sin(idx)
    mean = 0.01 * jnp.sin(0.5 * idx)
    var = jnp.ones((c,), jnp.float32)
    scale = gamma / jnp.sqrt(var + 1e-5)
    shift = beta - mean * scale
    return {"scale": scale, "shift": shift}


# ----------------------------------------------------------------------------
# Layer forward helpers (im2col glue + fused Pallas hot path)
# ----------------------------------------------------------------------------
def _conv_matmul(x, cp, scale, shift, stride, pad, relu, residual, out_dtype):
    k = cp["k"]
    cols, (B, Ho, Wo) = im2col(x, k, k, stride, pad)
    kp = cp["wmat"].shape[0]
    if cols.shape[1] != kp:                      # stem alignment pad only
        cols = jnp.pad(cols, ((0, 0), (0, kp - cols.shape[1])))
    res2d = None
    if residual is not None:
        res2d = residual.reshape(-1, residual.shape[-1])
    y = fused_matmul(cols, cp["wmat"], scale, shift, residual=res2d,
                     relu=relu, out_dtype=out_dtype)
    return y.reshape(B, Ho, Wo, -1)


def conv_bn_forward(x, cp, bnp, stride=1, pad=0, relu=True, residual=None,
                    out_dtype=jnp.bfloat16):
    """conv + BN (+ residual) (+ ReLU), all fused into one Pallas matmul."""
    return _conv_matmul(x, cp, bnp["scale"], bnp["shift"], stride, pad, relu,
                        residual, out_dtype)


def conv_forward(x, cp, stride=1, pad=0, relu=False, residual=None,
                 out_dtype=jnp.bfloat16):
    """plain conv (+ bias) — bias fused into the matmul epilogue."""
    cout = cp["wmat"].shape[1]
    scale = jnp.ones((cout,), jnp.float32)
    shift = cp.get("bias", jnp.zeros((cout,), jnp.float32))
    return _conv_matmul(x, cp, scale, shift, stride, pad, relu, residual,
                        out_dtype)


# ---------------------- ResNet18 backbone -----------------------------------
def make_basic_block(cin, cout, stride):
    p = {"conv1": make_conv(cin, cout, 3), "bn1": make_bn(cout),
         "conv2": make_conv(cout, cout, 3), "bn2": make_bn(cout),
         "stride": stride}
    if stride != 1 or cin != cout:
        p["down_conv"] = make_conv(cin, cout, 1)
        p["down_bn"] = make_bn(cout)
    return p


def basic_block_forward(x, p):
    out = conv_bn_forward(x, p["conv1"], p["bn1"], stride=p["stride"], pad=1,
                          relu=True)
    if "down_conv" in p:
        short = conv_bn_forward(x, p["down_conv"], p["down_bn"],
                                stride=p["stride"], pad=0, relu=False)
    else:
        short = x
    # conv2 + BN + residual add + ReLU fused into a single Pallas matmul.
    return conv_bn_forward(out, p["conv2"], p["bn2"], stride=1, pad=1,
                           relu=True, residual=short)


def make_resnet18():
    def make_layer(cin, cout, stride):
        return [make_basic_block(cin, cout, stride),
                make_basic_block(cout, cout, 1)]
    return {"conv1": make_conv(3, 64, 7), "bn1": make_bn(64),
            "layer1": make_layer(64, 64, 1),
            "layer2": make_layer(64, 128, 2),
            "layer3": make_layer(128, 256, 2),
            "layer4": make_layer(256, 512, 2)}


def resnet18_forward(x, p):
    x = conv_bn_forward(x, p["conv1"], p["bn1"], stride=2, pad=3, relu=True)
    x = maxpool2d(x, 3, 2, 1)
    for blk in p["layer1"]:
        x = basic_block_forward(x, blk)
    s1 = x
    for blk in p["layer2"]:
        x = basic_block_forward(x, blk)
    s2 = x
    for blk in p["layer3"]:
        x = basic_block_forward(x, blk)
    s3 = x
    for blk in p["layer4"]:
        x = basic_block_forward(x, blk)
    s4 = x
    return s1, s2, s3, s4


# ---------------------- PPM / FAM / SegHead ----------------------------------
PPM_BINS = (1, 2, 3, 6)


def make_ppm(cin, cout):
    p = {"branches": [{"conv": make_conv(cin, cout, 1), "bn": make_bn(cout)}
                      for _ in PPM_BINS]}
    p["proj_conv"] = make_conv(cin + cout * len(PPM_BINS), cout, 3)
    p["proj_bn"] = make_bn(cout)
    return p


def ppm_forward(x, p):
    B, H, W, C = x.shape
    feats = [x]
    for b, br in zip(PPM_BINS, p["branches"]):
        pooled = adaptive_avg_pool(x, b, b)
        y = conv_bn_forward(pooled, br["conv"], br["bn"], stride=1, pad=0,
                            relu=True)
        feats.append(upsample_bilinear_ac(y, H, W))
    cat = jnp.concatenate(feats, axis=-1)
    return conv_bn_forward(cat, p["proj_conv"], p["proj_bn"], stride=1, pad=1,
                           relu=True)


def make_fam(cin_low, cout):
    return {"down_l": make_conv(cin_low, cout, 1),
            "down_h": make_conv(cout, cout, 1),
            "flow": make_conv(cout * 2, 2, 3)}


def fam_forward(low, high, p):
    B, Hl, Wl, _ = low.shape
    l = conv_forward(low, p["down_l"], stride=1, pad=0)
    h = conv_forward(high, p["down_h"], stride=1, pad=0)
    h_up = upsample_bilinear_ac(h, Hl, Wl)
    flow = conv_forward(jnp.concatenate([h_up, l], axis=-1), p["flow"],
                        stride=1, pad=1)               # (B, Hl, Wl, 2)
    warped = flow_warp(high, flow, Hl, Wl)             # (B, Hl, Wl, Cout) f32
    C = l.shape[-1]
    out = pallas_add(l.reshape(-1, C),
                     warped.astype(l.dtype).reshape(-1, C), relu=False)
    return out.reshape(B, Hl, Wl, C)


def make_seghead(num_classes, cin, cmid):
    return {"conv1": make_conv(cin, cmid, 3), "bn1": make_bn(cmid),
            "conv2": make_conv(cmid, num_classes, 1, bias=True)}


def seghead_forward(x, p):
    x = conv_bn_forward(x, p["conv1"], p["bn1"], stride=1, pad=1, relu=True)
    return conv_forward(x, p["conv2"], stride=1, pad=0, out_dtype=jnp.float32)


# ---------------------- Full SFSegNet ----------------------------------------
def make_sfsegnet(num_classes):
    return {"backbone": make_resnet18(),
            "ppm": make_ppm(512, 128),
            "fam3": make_fam(256, 128),
            "fam2": make_fam(128, 128),
            "fam1": make_fam(64, 128),
            "seghead": make_seghead(num_classes, 512, 256)}


def sfsegnet_forward(x_nchw, p):
    # layout: accept NCHW like the PyTorch module, compute in NHWC/bf16,
    # return NCHW f32.
    x = jnp.transpose(x_nchw, (0, 2, 3, 1)).astype(jnp.bfloat16)
    s1, s2, s3, s4 = resnet18_forward(x, p["backbone"])
    feat4 = ppm_forward(s4, p["ppm"])
    feat3 = fam_forward(s3, feat4, p["fam3"])
    feat2 = fam_forward(s2, feat3, p["fam2"])
    feat1 = fam_forward(s1, feat2, p["fam1"])
    outs = [feat4, feat3, feat2, feat1]
    H, W = feat1.shape[1], feat1.shape[2]
    outs = [upsample_bilinear_ac(o, H, W) for o in outs]
    feat = jnp.concatenate(outs, axis=-1)          # 4 * 128 = 512 channels
    segout = seghead_forward(feat, p["seghead"])
    return jnp.transpose(segout, (0, 3, 1, 2)).astype(jnp.float32)


# ----------------------------------------------------------------------------
if __name__ == "__main__":
    NUM_CLASSES = 5
    params = make_sfsegnet(NUM_CLASSES)
    x = jax.random.normal(jax.random.PRNGKey(0), (2, 3, 64, 64), jnp.float32)
    out = sfsegnet_forward(x, params)
    out = jax.block_until_ready(out)
    assert out.shape == (2, NUM_CLASSES, 16, 16), out.shape
    assert bool(jnp.all(jnp.isfinite(out)))
    print("KERNEL_OK")
</pallas_src>

<mosaic_0001>
module attributes {stable_mosaic.version = 11 : i64} {
  func.func @_fused_mm_kernel(%arg0: i32, %arg1: i32, %arg2: i32, %arg3: memref<256x160xbf16, #tpu.memory_space<vmem>>, %arg4: memref<160x64xbf16, #tpu.memory_space<vmem>>, %arg5: memref<1x64xf32, #tpu.memory_space<vmem>>, %arg6: memref<1x64xf32, #tpu.memory_space<vmem>>, %arg7: memref<256x64xbf16, #tpu.memory_space<vmem>>, %arg8: memref<256x64xf32, #tpu.memory_space<vmem>>) attributes {dimension_semantics = [#tpu.dimension_semantics<parallel>, #tpu.dimension_semantics<parallel>, #tpu.dimension_semantics<arbitrary>], iteration_bounds = array<i64: 8, 1, 1>, scalar_prefetch = 0 : i64, scratch_operands = 1 : i64, tpu.core_type = #tpu.core_type<tc>, window_params = [{transform_indices = @transform_0, window_bounds = array<i64: 256, 160>}, {transform_indices = @transform_1, window_bounds = array<i64: 160, 64>}, {transform_indices = @transform_2, window_bounds = array<i64: 1, 64>}, {transform_indices = @transform_3, window_bounds = array<i64: 1, 64>}, {transform_indices = @transform_4, window_bounds = array<i64: 256, 64>}]} {
    %c0_i32 = arith.constant 0 : i32
    %0 = arith.cmpi eq, %arg2, %c0_i32 : i32
    %1 = arith.extui %0 : i1 to i32
    %c0_i32_0 = arith.constant 0 : i32
    %2 = arith.cmpi ne, %1, %c0_i32_0 : i32
    scf.if %2 {
      %cst_10 = arith.constant 0.000000e+00 : f32
      %12 = vector.broadcast %cst_10 : f32 to vector<256x64xf32>
      %c0_11 = arith.constant 0 : index
      %c0_12 = arith.constant 0 : index
      %13 = vector.load %arg8[%c0_11, %c0_12] : memref<256x64xf32, #tpu.memory_space<vmem>>, vector<256x64xf32>
      tpu.vector_store %arg8[%c0_11, %c0_12], %12 {strides = array<i32>} : memref<256x64xf32, #tpu.memory_space<vmem>>, vector<256x64xf32>,
    } else {
    }
    %c0 = arith.constant 0 : index
    %c0_1 = arith.constant 0 : index
    %3 = vector.load %arg8[%c0, %c0_1] : memref<256x64xf32, #tpu.memory_space<vmem>>, vector<256x64xf32>
    %c0_2 = arith.constant 0 : index
    %c0_3 = arith.constant 0 : index
    %4 = vector.load %arg3[%c0_2, %c0_3] : memref<256x160xbf16, #tpu.memory_space<vmem>>, vector<256x160xbf16>
    %c0_4 = arith.constant 0 : index
    %c0_5 = arith.constant 0 : index
    %5 = vector.load %arg4[%c0_4, %c0_5] : memref<160x64xbf16, #tpu.memory_space<vmem>>, vector<160x64xbf16>
    %cst = arith.constant dense<0.000000e+00> : vector<256x64xf32>
    %6 = tpu.matmul %4, %5, %cst {dimension_numbers = #tpu.dot_dimension_numbers<[1], [0], [0], [1], [0, 0, 1, 1], [], []>} : vector<256x160xbf16>, vector<160x64xbf16>, vector<256x64xf32> -> vector<256x64xf32>
    %7 = arith.addf %3, %6 : vector<256x64xf32>
    %c0_6 = arith.constant 0 : index
    %c0_7 = arith.constant 0 : index
    %8 = vector.load %arg8[%c0_6, %c0_7] : memref<256x64xf32, #tpu.memory_space<vmem>>, vector<256x64xf32>
    tpu.vector_store %arg8[%c0_6, %c0_7], %7 {strides = array<i32>} : memref<256x64xf32, #tpu.memory_space<vmem>>, vector<256x64xf32>,
    %c0_i32_8 = arith.constant 0 : i32
    %9 = arith.cmpi eq, %arg2, %c0_i32_8 : i32
    %10 = arith.extui %9 : i1 to i32
    %c0_i32_9 = arith.constant 0 : i32
    %11 = arith.cmpi ne, %10, %c0_i32_9 : i32
    scf.if %11 {
      %c0_10 = arith.constant 0 : index
      %c0_11 = arith.constant 0 : index
      %12 = vector.load %arg8[%c0_10, %c0_11] : memref<256x64xf32, #tpu.memory_space<vmem>>, vector<256x64xf32>
      %c0_12 = arith.constant 0 : index
      %c0_13 = arith.constant 0 : index
      %13 = vector.load %arg5[%c0_12, %c0_13] : memref<1x64xf32, #tpu.memory_space<vmem>>, vector<1x64xf32>
      %14 = vector.broadcast %13 : vector<1x64xf32> to vector<256x64xf32>
      %15 = arith.mulf %12, %14 : vector<256x64xf32>
      %c0_14 = arith.constant 0 : index
      %c0_15 = arith.constant 0 : index
      %16 = vector.load %arg6[%c0_14, %c0_15] : memref<1x64xf32, #tpu.memory_space<vmem>>, vector<1x64xf32>
      %17 = vector.broadcast %16 : vector<1x64xf32> to vector<256x64xf32>
      %18 = arith.addf %15, %17 : vector<256x64xf32>
      %cst_16 = arith.constant 0.000000e+00 : f32
      %19 = vector.broadcast %cst_16 : f32 to vector<256x64xf32>
      %20 = arith.maximumf %18, %19 : vector<256x64xf32>
      %21 = arith.truncf %20 : vector<256x64xf32> to vector<256x64xbf16>
      %c0_17 = arith.constant 0 : index
      %c0_18 = arith.constant 0 : index
      %22 = vector.load %arg7[%c0_17, %c0_18] : memref<256x64xbf16, #tpu.memory_space<vmem>>, vector<256x64xbf16>
      tpu.vector_store %arg7[%c0_17, %c0_18], %21 {strides = array<i32>} : memref<256x64xbf16, #tpu.memory_space<vmem>>, vector<256x64xbf16>,
    } else {
    }
    return
  }
  func.func @transform_0(%arg0: i32, %arg1: i32, %arg2: i32) -> (i32, i32) {
    %c0_i32 = arith.constant 0 : i32
    return %arg0, %arg2 : i32, i32
  }
  func.func @transform_1(%arg0: i32, %arg1: i32, %arg2: i32) -> (i32, i32) {
    %c0_i32 = arith.constant 0 : i32
    return %arg2, %arg1 : i32, i32
  }
  func.func @transform_2(%arg0: i32, %arg1: i32, %arg2: i32) -> (i32, i32) {
    %c0_i32 = arith.constant 0 : i32
    %c0_i32_0 = arith.constant 0 : i32
    return %c0_i32, %arg1 : i32, i32
  }
  func.func @transform_3(%arg0: i32, %arg1: i32, %arg2: i32) -> (i32, i32) {
    %c0_i32 = arith.constant 0 : i32
    %c0_i32_0 = arith.constant 0 : i32
    return %c0_i32, %arg1 : i32, i32
  }
  func.func @transform_4(%arg0: i32, %arg1: i32, %arg2: i32) -> (i32, i32) {
    %c0_i32 = arith.constant 0 : i32
    return %arg0, %arg1 : i32, i32
  }
}

</mosaic_0001>

<bundles_post_ra>
// kernel: tpu_custom_call.1
= control target key start
LH: loop header
LB: loop body
LE: loop exit
PB: predicated region body
PF: predicated region fallthrough
CT: control target
= control target key end

     0   :  { %s1636_s15 = smov 0   ;;  %s1638_s16 = smov 0   ;;  %s1977_s0 = inlined_call_operand.vmem [shape: bf16[2048,160], index: 0, kind: input, shape index: {}]   ;;  %s1978_s1 = inlined_call_operand.vmem [shape: bf16[160,64], index: 1, kind: input, shape index: {}]   ;;  %s1979_s2 = inlined_call_operand.vmem [shape: f32[1,64], index: 2, kind: input, shape index: {}]   ;;  %s1980_s3 = inlined_call_operand.vmem [shape: f32[1,64], index: 3, kind: input, shape index: {}]   ;;  %s1981_s4 = inlined_call_operand.vmem [shape: bf16[2048,64], index: 4, kind: output, shape index: {}]  }
   0x1   :  { %s1640_s17 = smov 0  }
   0x2 LB: > { %s33_s18 = sadd.s32 1, %s1603_s16  ;;  %p1348_p0 = scmp.ge.s32.totalorder %s1607_s17, 1  ;;  %s1607_s17 = sphi %s1640_s17, %s14_s17   ;;  %s1603_s16 = sphi %s1638_s16, %s1983_s16   ;;  %s1599_s15 = sphi %s1636_s15, %s1982_s15  }
   0x3   : > { %p35_p1 = scmp.ge.s32.totalorder %s33_s18, 8  ;;  %p224_p2 = scmp.lt.s32.totalorder %s1607_s17, 9 }
   0x5   : > { %s1985_s18 = smov (%p35_p1, %s33_s18), 0  ;;  %p225_p3 = pnand %p1348_p0, %p224_p2 }
   0x6   : > { %s1349_s21 = sshll.u32 (!%p225_p3), %s1599_s15, 5 }
   0x7   : > { %228 = sbr.rel (%p225_p3) target bundleno = 326 (0x146), region = 36  ;;  %p274_p4 = scmp.lt.s32.totalorder (!%p225_p3), %s1349_s21, 255 }
   0xc   : > { %v1527_v0 = vld [vmem:[%s1978_s1 + $0x38] sm:$0xff]   ;;  %v1609_v1 = vmov 0   ;;  %v1528_v2 = vld [vmem:[%s1978_s1 + $0x30] sm:$0xff]   ;;  %s1987_s21 = smov (!%p274_p4, %s1349_s21), 255  ;;  %v1529_v3 = vld [vmem:[%s1978_s1 + $0x28] sm:$0xff]   ;;  %vm313_vm0 = vcmask 523264  }
   0xd   : > { %683 = vmatprep.subr.bf16.mxu0 %v1609_v1  ;;  %1481 = vmatprep.subr.bf16.mxu1 %v1609_v1  ;;  %s1448_s26 = sshll.u32 %s1987_s21, 3  ;;  %v1610_v4 = vmov 0.0   ;;  %v1530_v5 = vld [vmem:[%s1978_s1 + $0x20] sm:$0xff]   ;;  %vm634_vm1 = vcmask 261120   ;;  %v1531_v8 = vld [vmem:[%s1978_s1 + $0x18] sm:$0xff]   ;;  %v1532_v9 = vld [vmem:[%s1978_s1 + $0x10] sm:$0xff]  }
   0xe   : > { %684 = vmatpush1.bf16.msra.mxu0 %v1527_v0  ;;  %1491 = vmatpush1.bf16.msra.mxu1 %v1527_v0  ;;  %s1675_s29 = scalar_lea.vmem %s1977_s0, %s1448_s26  ;;  %314 = vst.msk [vmem:[#allocation2] sm:$0xff] %vm313_vm0, %v1610_v4  ;;  %315 = vst.msk [vmem:[#allocation2 + $0x8] sm:$0xff] %vm313_vm0, %v1610_v4  ;;  %v1533_v10 = vld [vmem:[%s1978_s1 + $0x8] sm:$0xff]   ;;  %v1534_v11 = vld [vmem:[%s1978_s1] sm:$0xff]   ;;  %s1353_s26 = sshll.u32 %s1987_s21, 2  ;;  %vm1182_vm2 = vcmask 519168  }
   0xf   : > { %685 = vmatprep.subr.bf16.mxu0 %v1609_v1  ;;  %1482 = vmatprep.subr.bf16.mxu1 %v1609_v1  ;;  %316 = vst.msk [vmem:[#allocation2 + $0x10] sm:$0xff] %vm313_vm0, %v1610_v4  ;;  %317 = vst.msk [vmem:[#allocation2 + $0x18] sm:$0xff] %vm313_vm0, %v1610_v4  ;;  %v1539_v6 = vld [vmem:[%s1675_s29 + $0x4] ss:$8 sps:$4 sm:$0xff]   ;;  %v1537_v14 = vld [vmem:[%s1675_s29] ss:$8 sps:$4 sm:$0xff]   ;;  %s1820_s28 = scalar_lea.vmem %s1981_s4, %s1353_s26 }
  0x10   : > { %318 = vst.msk [vmem:[#allocation2 + $0x20] sm:$0xff] %vm313_vm0, %v1610_v4  ;;  %319 = vst.msk [vmem:[#allocation2 + $0x28] sm:$0xff] %vm313_vm0, %v1610_v4  ;;  %v1542_v7 = vld [vmem:[%s1675_s29 + $0x84] ss:$8 sps:$4 sm:$0xff]   ;;  %1396 = vmatprep.mubr.msk.bf16.mxu0 %vm634_vm1, %v1539_v6  ;;  %v1540_v15 = vld [vmem:[%s1675_s29 + $0x80] ss:$8 sps:$4 sm:$0xff]  }
  0x11   : > { %320 = vst.msk [vmem:[#allocation2 + $0x30] sm:$0xff] %vm313_vm0, %v1610_v4  ;;  %321 = vst.msk [vmem:[#allocation2 + $0x38] sm:$0xff] %vm313_vm0, %v1610_v4  ;;  %1404 = vmatprep.mubr.msk.bf16.mxu1 %vm634_vm1, %v1542_v7  ;;  %v1535_v12 = vld [vmem:[%s1978_s1 + $0x48] sm:$0xff]   ;;  %v1536_v13 = vld [vmem:[%s1978_s1 + $0x40] sm:$0xff]  }
  0x12   : > { %686 = vmatpush1.bf16.msra.mxu0 %v1528_v2  ;;  %1492 = vmatpush1.bf16.msra.mxu1 %v1528_v2  ;;  %322 = vst.msk [vmem:[#allocation2 + $0x40] sm:$0xff] %vm313_vm0, %v1610_v4  ;;  %323 = vst.msk [vmem:[#allocation2 + $0x48] sm:$0xff] %vm313_vm0, %v1610_v4  ;;  %v1543_v16 = vld [vmem:[%s1675_s29 + $0x14] ss:$8 sps:$4 sm:$0xff]   ;;  %v1547_v18 = vld [vmem:[%s1675_s29 + $0x10] ss:$8 sps:$4 sm:$0xff]  }
  0x13   : > { %687 = vmatprep.subr.bf16.mxu0 %v1609_v1  ;;  %1483 = vmatprep.subr.bf16.mxu1 %v1609_v1  ;;  %324 = vst.msk [vmem:[#allocation2 + $0x50] sm:$0xff] %vm313_vm0, %v1610_v4  ;;  %325 = vst.msk [vmem:[#allocation2 + $0x58] sm:$0xff] %vm313_vm0, %v1610_v4  ;;  %v1545_v17 = vld [vmem:[%s1675_s29 + $0x94] ss:$8 sps:$4 sm:$0xff]   ;;  %v1548_v19 = vld [vmem:[%s1675_s29 + $0x90] ss:$8 sps:$4 sm:$0xff]  }
  0x14   : > { %326 = vst.msk [vmem:[#allocation2 + $0x60] sm:$0xff] %vm313_vm0, %v1610_v4  ;;  %327 = vst.msk [vmem:[#allocation2 + $0x68] sm:$0xff] %vm313_vm0, %v1610_v4  ;;  %v1549_v20 = vld [vmem:[%s1675_s29 + $0x24] ss:$8 sps:$4 sm:$0xff]   ;;  %v1553_v22 = vld [vmem:[%s1675_s29 + $0x20] ss:$8 sps:$4 sm:$0xff]  }
  0x15   : > { %328 = vst.msk [vmem:[#allocation2 + $0x70] sm:$0xff] %vm313_vm0, %v1610_v4  ;;  %329 = vst.msk [vmem:[#allocation2 + $0x78] sm:$0xff] %vm313_vm0, %v1610_v4  ;;  %v1551_v21 = vld [vmem:[%s1675_s29 + $0xa4] ss:$8 sps:$4 sm:$0xff]   ;;  %v1554_v23 = vld [vmem:[%s1675_s29 + $0xa0] ss:$8 sps:$4 sm:$0xff]  }
  0x16   : > { %330 = vst.msk [vmem:[#allocation2 + $0x80] sm:$0xff] %vm313_vm0, %v1610_v4  ;;  %331 = vst.msk [vmem:[#allocation2 + $0x88] sm:$0xff] %vm313_vm0, %v1610_v4  ;;  %688 = vmatpush1.bf16.msra.mxu0 %v1529_v3  ;;  %1493 = vmatpush1.bf16.msra.mxu1 %v1529_v3  ;;  %v1555_v24 = vld [vmem:[%s1675_s29 + $0x34] ss:$8 sps:$4 sm:$0xff]   ;;  %v1559_v26 = vld [vmem:[%s1675_s29 + $0x30] ss:$8 sps:$4 sm:$0xff]  }
  0x17   : > { %332 = vst.msk [vmem:[#allocation2 + $0x90] sm:$0xff] %vm313_vm0, %v1610_v4  ;;  %333 = vst.msk [vmem:[#allocation2 + $0x98] sm:$0xff] %vm313_vm0, %v1610_v4  ;;  %689 = vmatprep.subr.bf16.mxu0 %v1609_v1  ;;  %1484 = vmatprep.subr.bf16.mxu1 %v1609_v1  ;;  %v1557_v25 = vld [vmem:[%s1675_s29 + $0xb4] ss:$8 sps:$4 sm:$0xff]   ;;  %v1560_v27 = vld [vmem:[%s1675_s29 + $0xb0] ss:$8 sps:$4 sm:$0xff]  }
  0x18   : > { %334 = vst.msk [vmem:[#allocation2 + $0xa0] sm:$0xff] %vm313_vm0, %v1610_v4  ;;  %335 = vst.msk [vmem:[#allocation2 + $0xa8] sm:$0xff] %vm313_vm0, %v1610_v4  ;;  %v1561_v28 = vld [vmem:[%s1675_s29 + $0x44] ss:$8 sps:$4 sm:$0xff]   ;;  %v1565_v30 = vld [vmem:[%s1675_s29 + $0x40] ss:$8 sps:$4 sm:$0xff]  }
  0x19   : > { %336 = vst.msk [vmem:[#allocation2 + $0xb0] sm:$0xff] %vm313_vm0, %v1610_v4  ;;  %337 = vst.msk [vmem:[#allocation2 + $0xb8] sm:$0xff] %vm313_vm0, %v1610_v4  ;;  %v1563_v29 = vld [vmem:[%s1675_s29 + $0xc4] ss:$8 sps:$4 sm:$0xff]   ;;  %v1566_v31 = vld [vmem:[%s1675_s29 + $0xc0] ss:$8 sps:$4 sm:$0xff]  }
  0x1a   : > { %338 = vst.msk [vmem:[#allocation2 + $0xc0] sm:$0xff] %vm313_vm0, %v1610_v4  ;;  %339 = vst.msk [vmem:[#allocation2 + $0xc8] sm:$0xff] %vm313_vm0, %v1610_v4  ;;  %690 = vmatpush1.bf16.msra.mxu0 %v1530_v5  ;;  %1494 = vmatpush1.bf16.msra.mxu1 %v1530_v5  ;;  %v1567_v32 = vld [vmem:[%s1675_s29 + $0x54] ss:$8 sps:$4 sm:$0xff]   ;;  %v1571_v34 = vld [vmem:[%s1675_s29 + $0x50] ss:$8 sps:$4 sm:$0xff]  }
  0x1b   : > { %340 = vst.msk [vmem:[#allocation2 + $0xd0] sm:$0xff] %vm313_vm0, %v1610_v4  ;;  %341 = vst.msk [vmem:[#allocation2 + $0xd8] sm:$0xff] %vm313_vm0, %v1610_v4  ;;  %691 = vmatprep.subr.bf16.mxu0 %v1609_v1  ;;  %1485 = vmatprep.subr.bf16.mxu1 %v1609_v1  ;;  %v1569_v33 = vld [vmem:[%s1675_s29 + $0xd4] ss:$8 sps:$4 sm:$0xff]   ;;  %v1572_v35 = vld [vmem:[%s1675_s29 + $0xd0] ss:$8 sps:$4 sm:$0xff]  }
  0x1c   : > { %342 = vst.msk [vmem:[#allocation2 + $0xe0] sm:$0xff] %vm313_vm0, %v1610_v4  ;;  %343 = vst.msk [vmem:[#allocation2 + $0xe8] sm:$0xff] %vm313_vm0, %v1610_v4  ;;  %v1573_v36 = vld [vmem:[%s1675_s29 + $0x64] ss:$8 sps:$4 sm:$0xff]   ;;  %v1577_v38 = vld [vmem:[%s1675_s29 + $0x60] ss:$8 sps:$4 sm:$0xff]  }
  0x1d   : > { %344 = vst.msk [vmem:[#allocation2 + $0xf0] sm:$0xff] %vm313_vm0, %v1610_v4  ;;  %345 = vst.msk [vmem:[#allocation2 + $0xf8] sm:$0xff] %vm313_vm0, %v1610_v4  ;;  %v1575_v37 = vld [vmem:[%s1675_s29 + $0xe4] ss:$8 sps:$4 sm:$0xff]   ;;  %v1578_v39 = vld [vmem:[%s1675_s29 + $0xe0] ss:$8 sps:$4 sm:$0xff]  }
  0x1e   : > { %692 = vmatpush1.bf16.msra.mxu0 %v1531_v8  ;;  %1495 = vmatpush1.bf16.msra.mxu1 %v1531_v8  ;;  %v1579_v40 = vld [vmem:[%s1675_s29 + $0x74] ss:$8 sps:$4 sm:$0xff]   ;;  %v1583_v42 = vld [vmem:[%s1675_s29 + $0x70] ss:$8 sps:$4 sm:$0xff]   ;;  %v346_v44 = vld [vmem:[#allocation2] sm:$0xff] }
  0x1f   : > { %693 = vmatprep.subr.bf16.mxu0 %v1609_v1  ;;  %1486 = vmatprep.subr.bf16.mxu1 %v1609_v1  ;;  %v1581_v41 = vld [vmem:[%s1675_s29 + $0xf4] ss:$8 sps:$4 sm:$0xff]   ;;  %v1584_v43 = vld [vmem:[%s1675_s29 + $0xf0] ss:$8 sps:$4 sm:$0xff]   ;;  %v362_v45 = vld [vmem:[#allocation2 + $0x80] sm:$0xff] }
  0x20   : > { %v347_v52 = vld [vmem:[#allocation2 + $0x8] sm:$0xff]  ;;  %v348_v60 = vld [vmem:[#allocation2 + $0x10] sm:$0xff]  ;;  %v1799_v62 = vld [vmem:[%s1979_s2] ss:$0 sm:$0xff] }
  0x21   : > { %v363_v53 = vld [vmem:[#allocation2 + $0x88] sm:$0xff]  ;;  %v364_v61 = vld [vmem:[#allocation2 + $0x90] sm:$0xff]  ;;  %v349_v4 = vld [vmem:[#allocation2 + $0x18] sm:$0xff] }
  0x22   : > { %694 = vmatpush1.bf16.msra.mxu0 %v1532_v9  ;;  %1496 = vmatpush1.bf16.msra.mxu1 %v1532_v9  ;;  %v365_v9 = vld [vmem:[#allocation2 + $0x98] sm:$0xff] }
  0x23   : > { %695 = vmatprep.subr.bf16.mxu0 %v1609_v1  ;;  %1487 = vmatprep.subr.bf16.mxu1 %v1609_v1 }
  0x26   : > { %696 = vmatpush1.bf16.msra.mxu0 %v1533_v10  ;;  %1497 = vmatpush1.bf16.msra.mxu1 %v1533_v10 }
  0x27   : > { %697 = vmatprep.subr.bf16.mxu0 %v1609_v1  ;;  %1488 = vmatprep.subr.bf16.mxu1 %v1609_v1 }
  0x2a   : > { %698 = vmatpush1.bf16.msra.mxu0 %v1534_v11  ;;  %1498 = vmatpush1.bf16.msra.mxu1 %v1534_v11 }
  0x2b   : > { %711 = vmatprep.subr.bf16.mxu0 %v1609_v1  ;;  %1489 = vmatprep.subr.bf16.mxu1 %v1609_v1 }
  0x2e   : > { %712 = vmatpush2.bf16.msra.mxu0 %v1535_v12  ;;  %1499 = vmatpush2.bf16.msra.mxu1 %v1535_v12 }
  0x2f   : > { %713 = vmatprep.subr.bf16.mxu0 %v1609_v1  ;;  %1490 = vmatprep.subr.bf16.mxu1 %v1609_v1  ;;  %v1804_v1 = vld [vmem:[%s1980_s3] ss:$0 sm:$0xff] }
  0x32   : > { %714 = vmatpush2.bf16.msra.mxu0 %v1536_v13  ;;  %1500 = vmatpush2.bf16.msra.mxu1 %v1536_v13 }
  0x35   : > { %716 = vmatmul.mubr.bf16.vlgmr.msra.gmra.mxu0 %v1537_v14  ;;  %780 = vmatmul.mubr.bf16.vlgmr.msra.gmra.mxu1 %v1540_v15 }
  0x36   : > { %1397 = vmatprep.mubr.msk.bf16.mxu0 %vm634_vm1, %v1543_v16  ;;  %1405 = vmatprep.mubr.msk.bf16.mxu1 %vm634_vm1, %v1545_v17 }
  0x3d   : > { %724 = vmatmul.mubr.bf16.gmra.mxu0 %v1547_v18  ;;  %788 = vmatmul.mubr.bf16.gmra.mxu1 %v1548_v19 }
  0x3e   : > { %1398 = vmatprep.mubr.msk.bf16.mxu0 %vm634_vm1, %v1549_v20  ;;  %1406 = vmatprep.mubr.msk.bf16.mxu1 %vm634_vm1, %v1551_v21 }
  0x45   : > { %732 = vmatmul.mubr.bf16.gmra.mxu0 %v1553_v22  ;;  %796 = vmatmul.mubr.bf16.gmra.mxu1 %v1554_v23 }
  0x46   : > { %1399 = vmatprep.mubr.msk.bf16.mxu0 %vm634_vm1, %v1555_v24  ;;  %1407 = vmatprep.mubr.msk.bf16.mxu1 %vm634_vm1, %v1557_v25 }
  0x4d   : > { %740 = vmatmul.mubr.bf16.gmra.mxu0 %v1559_v26  ;;  %804 = vmatmul.mubr.bf16.gmra.mxu1 %v1560_v27  ;;  %v350_v26 = vld [vmem:[#allocation2 + $0x20] sm:$0xff] }
  0x4e   : > { %1400 = vmatprep.mubr.msk.bf16.mxu0 %vm634_vm1, %v1561_v28  ;;  %1408 = vmatprep.mubr.msk.bf16.mxu1 %vm634_vm1, %v1563_v29  ;;  %v366_v27 = vld [vmem:[#allocation2 + $0xa0] sm:$0xff] }
  0x55   : > { %748 = vmatmul.mubr.bf16.gmra.mxu0 %v1565_v30  ;;  %812 = vmatmul.mubr.bf16.gmra.mxu1 %v1566_v31 }
  0x56   : > { %1401 = vmatprep.mubr.msk.bf16.mxu0 %vm634_vm1, %v1567_v32  ;;  %1409 = vmatprep.mubr.msk.bf16.mxu1 %vm634_vm1, %v1569_v33 }
  0x5d   : > { %756 = vmatmul.mubr.bf16.gmra.mxu0 %v1571_v34  ;;  %820 = vmatmul.mubr.bf16.gmra.mxu1 %v1572_v35 }
  0x5e   : > { %1402 = vmatprep.mubr.msk.bf16.mxu0 %vm634_vm1, %v1573_v36  ;;  %1410 = vmatprep.mubr.msk.bf16.mxu1 %vm634_vm1, %v1575_v37 }
  0x65   : > { %764 = vmatmul.mubr.bf16.gmra.mxu0 %v1577_v38  ;;  %828 = vmatmul.mubr.bf16.gmra.mxu1 %v1578_v39 }
  0x66   : > { %1403 = vmatprep.mubr.msk.bf16.mxu0 %vm634_vm1, %v1579_v40  ;;  %1411 = vmatprep.mubr.msk.bf16.mxu1 %vm634_vm1, %v1581_v41 }
  0x6d   : > { %772 = vmatmul.mubr.bf16.gmra.mxu0 %v1583_v42  ;;  %836 = vmatmul.mubr.bf16.gmra.mxu1 %v1584_v43 }
  0xf5   : > { %v717_v46 = vpop.f32.mrf.mxu0  ;;  %v781_v47 = vpop.f32.mrf.mxu1 }
  0xf6   : > { %v844_v48 = vadd.f32 %v717_v46, %v346_v44  ;;  %v860_v49 = vadd.f32 %v781_v47, %v362_v45  ;;  %v351_v44 = vld [vmem:[#allocation2 + $0x28] sm:$0xff] }
  0xf7   : > { %v719_v50 = vpop.f32.mrf.mxu0  ;;  %v783_v51 = vpop.f32.mrf.mxu1  ;;  %v367_v45 = vld [vmem:[#allocation2 + $0xa8] sm:$0xff] }
  0xf8   : > { %877 = vst.msk [vmem:[#allocation2] sm:$0xff] %vm313_vm0, %v844_v48  ;;  %893 = vst.msk [vmem:[#allocation2 + $0x80] sm:$0xff] %vm313_vm0, %v860_v49 }
  0xf9   : > { %v720_v54 = vpop.f32.mrf.mxu0  ;;  %v784_v55 = vpop.f32.mrf.mxu1 }
  0xfa   : > { %v845_v56 = vadd.f32 %v720_v54, %v347_v52  ;;  %v861_v57 = vadd.f32 %v784_v55, %v363_v53 }
  0xfb   : > { %v722_v58 = vpop.f32.mrf.mxu0  ;;  %v786_v59 = vpop.f32.mrf.mxu1 }
  0xfc   : > { %878 = vst.msk [vmem:[#allocation2 + $0x8] sm:$0xff] %vm313_vm0, %v845_v56  ;;  %894 = vst.msk [vmem:[#allocation2 + $0x88] sm:$0xff] %vm313_vm0, %v861_v57 }
  0xfd   : > { %v725_v63 = vpop.f32.mrf.mxu0  ;;  %v789_v0 = vpop.f32.mrf.mxu1 }
  0xfe   : > { %v846_v2 = vadd.f32 %v725_v63, %v348_v60  ;;  %v862_v3 = vadd.f32 %v789_v0, %v364_v61  ;;  %v352_v63 = vld [vmem:[#allocation2 + $0x30] sm:$0xff] }
  0xff   : > { %v912_v5 = vld [vmem:[#allocation2] sm:$0xff]  ;;  %v727_v7 = vpop.f32.mrf.mxu0  ;;  %v791_v8 = vpop.f32.mrf.mxu1  ;;  %v368_v0 = vld [vmem:[#allocation2 + $0xb0] sm:$0xff] }
 0x100   : > { %v928_v6 = vld [vmem:[#allocation2 + $0x80] sm:$0xff]  ;;  %v951_v10 = vmul.f32 %v1799_v62, %v912_v5  ;;  %879 = vst.msk [vmem:[#allocation2 + $0x10] sm:$0xff] %vm313_vm0, %v846_v2  ;;  %895 = vst.msk [vmem:[#allocation2 + $0x90] sm:$0xff] %vm313_vm0, %v862_v3 }
 0x101   : > { %v967_v11 = vmul.f32 %v1799_v62, %v928_v6  ;;  %v728_v12 = vpop.f32.mrf.mxu0  ;;  %v792_v13 = vpop.f32.mrf.mxu1 }
 0x102   : > { %v990_v14 = vadd.f32 %v1804_v1, %v951_v10  ;;  %v847_v16 = vadd.f32 %v728_v12, %v349_v4  ;;  %v863_v17 = vadd.f32 %v792_v13, %v365_v9  ;;  %v353_v12 = vld [vmem:[#allocation2 + $0x38] sm:$0xff] }
 0x103   : > { %v1006_v15 = vadd.f32 %v1804_v1, %v967_v11  ;;  %v913_v18 = vld [vmem:[#allocation2 + $0x8] sm:$0xff]  ;;  %v730_v20 = vpop.f32.mrf.mxu0  ;;  %v794_v21 = vpop.f32.mrf.mxu1  ;;  %v369_v13 = vld [vmem:[#allocation2 + $0xb8] sm:$0xff] }
 0x104   : > { %v929_v19 = vld [vmem:[#allocation2 + $0x88] sm:$0xff]  ;;  %v1022_v22 = vmax.f32 %v990_v14, 0.0  ;;  %v952_v24 = vmul.f32 %v1799_v62, %v913_v18  ;;  %880 = vst.msk [vmem:[#allocation2 + $0x18] sm:$0xff] %vm313_vm0, %v847_v16  ;;  %896 = vst.msk [vmem:[#allocation2 + $0x98] sm:$0xff] %vm313_vm0, %v863_v17 }
 0x105   : > { %v1038_v23 = vmax.f32 %v1006_v15, 0.0  ;;  %v968_v25 = vmul.f32 %v1799_v62, %v929_v19  ;;  %v733_v28 = vpop.f32.mrf.mxu0  ;;  %v797_v29 = vpop.f32.mrf.mxu1 }
 0x106   : > { %v1449_v30 = vpack.c.bf16 %v1022_v22, %v1022_v22  ;;  %v991_v32 = vadd.f32 %v1804_v1, %v952_v24  ;;  %v848_v36 = vadd.f32 %v733_v28, %v350_v26  ;;  %v864_v37 = vadd.f32 %v797_v29, %v366_v27 }
 0x107   : > { %v1465_v31 = vpack.c.bf16 %v1038_v23, %v1038_v23  ;;  %v1007_v33 = vadd.f32 %v1804_v1, %v968_v25  ;;  %v914_v34 = vld [vmem:[#allocation2 + $0x10] sm:$0xff]  ;;  %v735_v38 = vpop.f32.mrf.mxu0  ;;  %v799_v39 = vpop.f32.mrf.mxu1 }
 0x108   : > { %v930_v35 = vld [vmem:[#allocation2 + $0x90] sm:$0xff]  ;;  %1183 = vst.msk [vmem:[%s1820_s28] sm:$0xf] %vm1182_vm2, %v1449_v30  ;;  %v1023_v40 = vmax.f32 %v991_v32, 0.0  ;;  %v953_v42 = vmul.f32 %v1799_v62, %v914_v34  ;;  %v354_v30 = vld [vmem:[#allocation2 + $0x40] sm:$0xff] }
 0x109   : > { %1199 = vst.msk [vmem:[%s1820_s28 + $0x40] sm:$0xf] %vm1182_vm2, %v1465_v31  ;;  %v1039_v41 = vmax.f32 %v1007_v33, 0.0  ;;  %v969_v43 = vmul.f32 %v1799_v62, %v930_v35  ;;  %v736_v46 = vpop.f32.mrf.mxu0  ;;  %v800_v47 = vpop.f32.mrf.mxu1  ;;  %v370_v31 = vld [vmem:[#allocation2 + $0xc0] sm:$0xff] }
 0x10a   : > { %881 = vst.msk [vmem:[#allocation2 + $0x20] sm:$0xff] %vm313_vm0, %v848_v36  ;;  %897 = vst.msk [vmem:[#allocation2 + $0xa0] sm:$0xff] %vm313_vm0, %v864_v37  ;;  %v1450_v48 = vpack.c.bf16 %v1023_v40, %v1023_v40  ;;  %v992_v50 = vadd.f32 %v1804_v1, %v953_v42  ;;  %v849_v54 = vadd.f32 %v736_v46, %v351_v44 }
 0x10b   : > { %v1466_v49 = vpack.c.bf16 %v1039_v41, %v1039_v41  ;;  %v1008_v51 = vadd.f32 %v1804_v1, %v969_v43  ;;  %v915_v52 = vld [vmem:[#allocation2 + $0x18] sm:$0xff]  ;;  %v865_v55 = vadd.f32 %v800_v47, %v367_v45  ;;  %v738_v56 = vpop.f32.mrf.mxu0  ;;  %v802_v57 = vpop.f32.mrf.mxu1 }
 0x10c   : > { %v931_v53 = vld [vmem:[#allocation2 + $0x98] sm:$0xff]  ;;  %1184 = vst.msk [vmem:[%s1820_s28 + $0x4] sm:$0xf] %vm1182_vm2, %v1450_v48  ;;  %v1024_v58 = vmax.f32 %v992_v50, 0.0  ;;  %v954_v60 = vmul.f32 %v1799_v62, %v915_v52  ;;  %v355_v48 = vld [vmem:[#allocation2 + $0x48] sm:$0xff] }
 0x10d   : > { %1200 = vst.msk [vmem:[%s1820_s28 + $0x44] sm:$0xf] %vm1182_vm2, %v1466_v49  ;;  %v1040_v59 = vmax.f32 %v1008_v51, 0.0  ;;  %v970_v61 = vmul.f32 %v1799_v62, %v931_v53  ;;  %v741_v2 = vpop.f32.mrf.mxu0  ;;  %v805_v3 = vpop.f32.mrf.mxu1  ;;  %v371_v49 = vld [vmem:[#allocation2 + $0xc8] sm:$0xff] }
 0x10e   : > { %882 = vst.msk [vmem:[#allocation2 + $0x28] sm:$0xff] %vm313_vm0, %v849_v54  ;;  %898 = vst.msk [vmem:[#allocation2 + $0xa8] sm:$0xff] %vm313_vm0, %v865_v55  ;;  %v1451_v4 = vpack.c.bf16 %v1024_v58, %v1024_v58  ;;  %v993_v6 = vadd.f32 %v1804_v1, %v954_v60  ;;  %v850_v8 = vadd.f32 %v741_v2, %v352_v63  ;;  %v356_v60 = vld [vmem:[#allocation2 + $0x50] sm:$0xff] }
 0x10f   : > { %v1467_v5 = vpack.c.bf16 %v1040_v59, %v1040_v59  ;;  %v1009_v7 = vadd.f32 %v1804_v1, %v970_v61  ;;  %v866_v9 = vadd.f32 %v805_v3, %v368_v0  ;;  %v743_v10 = vpop.f32.mrf.mxu0  ;;  %v807_v11 = vpop.f32.mrf.mxu1 }
 0x110   : > { %1185 = vst.msk [vmem:[%s1820_s28 + $0x8] sm:$0xf] %vm1182_vm2, %v1451_v4  ;;  %v1025_v14 = vmax.f32 %v993_v6, 0.0 }
 0x111   : > { %1201 = vst.msk [vmem:[%s1820_s28 + $0x48] sm:$0xf] %vm1182_vm2, %v1467_v5  ;;  %v1041_v15 = vmax.f32 %v1009_v7, 0.0  ;;  %v916_v16 = vld [vmem:[#allocation2 + $0x20] sm:$0xff]  ;;  %v744_v20 = vpop.f32.mrf.mxu0  ;;  %v808_v21 = vpop.f32.mrf.mxu1  ;;  %v372_v7 = vld [vmem:[#allocation2 + $0xd0] sm:$0xff] }
 0x112   : > { %v932_v17 = vld [vmem:[#allocation2 + $0xa0] sm:$0xff]  ;;  %v955_v18 = vmul.f32 %v1799_v62, %v916_v16  ;;  %883 = vst.msk [vmem:[#allocation2 + $0x30] sm:$0xff] %vm313_vm0, %v850_v8  ;;  %899 = vst.msk [vmem:[#allocation2 + $0xb0] sm:$0xff] %vm313_vm0, %v866_v9  ;;  %v1452_v22 = vpack.c.bf16 %v1025_v14, %v1025_v14  ;;  %v851_v24 = vadd.f32 %v744_v20, %v353_v12 }
 0x113   : > { %v971_v19 = vmul.f32 %v1799_v62, %v932_v17  ;;  %v1468_v23 = vpack.c.bf16 %v1041_v15, %v1041_v15  ;;  %v867_v25 = vadd.f32 %v808_v21, %v369_v13  ;;  %v746_v28 = vpop.f32.mrf.mxu0  ;;  %v810_v29 = vpop.f32.mrf.mxu1 }
 0x114   : > { %v994_v26 = vadd.f32 %v1804_v1, %v955_v18  ;;  %1186 = vst.msk [vmem:[%s1820_s28 + $0xc] sm:$0xf] %vm1182_vm2, %v1452_v22  ;;  %v357_v28 = vld [vmem:[#allocation2 + $0x58] sm:$0xff] }
 0x115   : > { %v1010_v27 = vadd.f32 %v1804_v1, %v971_v19  ;;  %1202 = vst.msk [vmem:[%s1820_s28 + $0x4c] sm:$0xf] %vm1182_vm2, %v1468_v23  ;;  %v917_v32 = vld [vmem:[#allocation2 + $0x28] sm:$0xff]  ;;  %v749_v38 = vpop.f32.mrf.mxu0  ;;  %v813_v39 = vpop.f32.mrf.mxu1  ;;  %v373_v29 = vld [vmem:[#allocation2 + $0xd8] sm:$0xff] }
 0x116   : > { %v933_v33 = vld [vmem:[#allocation2 + $0xa8] sm:$0xff]  ;;  %884 = vst.msk [vmem:[#allocation2 + $0x38] sm:$0xff] %vm313_vm0, %v851_v24  ;;  %900 = vst.msk [vmem:[#allocation2 + $0xb8] sm:$0xff] %vm313_vm0, %v867_v25  ;;  %v1026_v34 = vmax.f32 %v994_v26, 0.0  ;;  %v956_v36 = vmul.f32 %v1799_v62, %v917_v32  ;;  %v852_v40 = vadd.f32 %v749_v38, %v354_v30  ;;  %v868_v41 = vadd.f32 %v813_v39, %v370_v31 }
 0x117   : > { %v1042_v35 = vmax.f32 %v1010_v27, 0.0  ;;  %v972_v37 = vmul.f32 %v1799_v62, %v933_v33  ;;  %v751_v46 = vpop.f32.mrf.mxu0  ;;  %v815_v47 = vpop.f32.mrf.mxu1 }
 0x118   : > { %v1453_v42 = vpack.c.bf16 %v1026_v34, %v1026_v34  ;;  %v995_v44 = vadd.f32 %v1804_v1, %v956_v36  ;;  %885 = vst.msk [vmem:[#allocation2 + $0x40] sm:$0xff] %vm313_vm0, %v852_v40  ;;  %901 = vst.msk [vmem:[#allocation2 + $0xc0] sm:$0xff] %vm313_vm0, %v868_v41  ;;  %v358_v46 = vld [vmem:[#allocation2 + $0x60] sm:$0xff] }
 0x119   : > { %v1469_v43 = vpack.c.bf16 %v1042_v35, %v1042_v35  ;;  %v1011_v45 = vadd.f32 %v1804_v1, %v972_v37  ;;  %v918_v50 = vld [vmem:[#allocation2 + $0x30] sm:$0xff]  ;;  %v752_v56 = vpop.f32.mrf.mxu0  ;;  %v816_v57 = vpop.f32.mrf.mxu1  ;;  %v374_v47 = vld [vmem:[#allocation2 + $0xe0] sm:$0xff] }
 0x11a   : > { %v934_v51 = vld [vmem:[#allocation2 + $0xb0] sm:$0xff]  ;;  %1187 = vst.msk [vmem:[%s1820_s28 + $0x10] sm:$0xf] %vm1182_vm2, %v1453_v42  ;;  %v1027_v52 = vmax.f32 %v995_v44, 0.0  ;;  %v957_v54 = vmul.f32 %v1799_v62, %v918_v50  ;;  %v853_v58 = vadd.f32 %v752_v56, %v355_v48  ;;  %v869_v59 = vadd.f32 %v816_v57, %v371_v49 }
 0x11b   : > { %1203 = vst.msk [vmem:[%s1820_s28 + $0x50] sm:$0xf] %vm1182_vm2, %v1469_v43  ;;  %v1043_v53 = vmax.f32 %v1011_v45, 0.0  ;;  %v973_v55 = vmul.f32 %v1799_v62, %v934_v51  ;;  %v754_v5 = vpop.f32.mrf.mxu0  ;;  %v818_v6 = vpop.f32.mrf.mxu1 }
 0x11c   : > { %v1454_v61 = vpack.c.bf16 %v1027_v52, %v1027_v52  ;;  %v996_v0 = vadd.f32 %v1804_v1, %v957_v54  ;;  %886 = vst.msk [vmem:[#allocation2 + $0x48] sm:$0xff] %vm313_vm0, %v853_v58  ;;  %902 = vst.msk [vmem:[#allocation2 + $0xc8] sm:$0xff] %vm313_vm0, %v869_v59 }
 0x11d   : > { %v1470_v63 = vpack.c.bf16 %v1043_v53, %v1043_v53  ;;  %v1012_v2 = vadd.f32 %v1804_v1, %v973_v55  ;;  %v919_v3 = vld [vmem:[#allocation2 + $0x38] sm:$0xff]  ;;  %v757_v12 = vpop.f32.mrf.mxu0  ;;  %v821_v13 = vpop.f32.mrf.mxu1 }
 0x11e   : > { %v935_v4 = vld [vmem:[#allocation2 + $0xb8] sm:$0xff]  ;;  %v958_v8 = vmul.f32 %v1799_v62, %v919_v3  ;;  %1188 = vst.msk [vmem:[%s1820_s28 + $0x14] sm:$0xf] %vm1182_vm2, %v1454_v61  ;;  %v1028_v10 = vmax.f32 %v996_v0, 0.0  ;;  %v854_v16 = vadd.f32 %v757_v12, %v356_v60  ;;  %v870_v17 = vadd.f32 %v821_v13, %v372_v7  ;;  %v375_v3 = vld [vmem:[#allocation2 + $0xe8] sm:$0xff] }
 0x11f   : > { %v974_v9 = vmul.f32 %v1799_v62, %v935_v4  ;;  %1204 = vst.msk [vmem:[%s1820_s28 + $0x54] sm:$0xf] %vm1182_vm2, %v1470_v63  ;;  %v1044_v11 = vmax.f32 %v1012_v2, 0.0  ;;  %v920_v20 = vld [vmem:[#allocation2 + $0x40] sm:$0xff]  ;;  %v759_v22 = vpop.f32.mrf.mxu0  ;;  %v823_v23 = vpop.f32.mrf.mxu1  ;;  %v359_v2 = vld [vmem:[#allocation2 + $0x68] sm:$0xff] }
 0x120   : > { %v997_v14 = vadd.f32 %v1804_v1, %v958_v8  ;;  %v1455_v18 = vpack.c.bf16 %v1028_v10, %v1028_v10  ;;  %v936_v21 = vld [vmem:[#allocation2 + $0xc0] sm:$0xff]  ;;  %v959_v26 = vmul.f32 %v1799_v62, %v920_v20  ;;  %887 = vst.msk [vmem:[#allocation2 + $0x50] sm:$0xff] %vm313_vm0, %v854_v16  ;;  %903 = vst.msk [vmem:[#allocation2 + $0xd0] sm:$0xff] %vm313_vm0, %v870_v17 }
 0x121   : > { %v1013_v15 = vadd.f32 %v1804_v1, %v974_v9  ;;  %v1471_v19 = vpack.c.bf16 %v1044_v11, %v1044_v11  ;;  %v975_v27 = vmul.f32 %v1799_v62, %v936_v21  ;;  %v760_v30 = vpop.f32.mrf.mxu0  ;;  %v824_v31 = vpop.f32.mrf.mxu1 }
 0x122   : > { %v1029_v24 = vmax.f32 %v997_v14, 0.0  ;;  %1189 = vst.msk [vmem:[%s1820_s28 + $0x18] sm:$0xf] %vm1182_vm2, %v1455_v18  ;;  %v998_v34 = vadd.f32 %v1804_v1, %v959_v26  ;;  %v855_v38 = vadd.f32 %v760_v30, %v357_v28  ;;  %v871_v39 = vadd.f32 %v824_v31, %v373_v29  ;;  %v360_v14 = vld [vmem:[#allocation2 + $0x70] sm:$0xff] }
 0x123   : > { %v1045_v25 = vmax.f32 %v1013_v15, 0.0  ;;  %1205 = vst.msk [vmem:[%s1820_s28 + $0x58] sm:$0xf] %vm1182_vm2, %v1471_v19  ;;  %v1014_v35 = vadd.f32 %v1804_v1, %v975_v27  ;;  %v921_v36 = vld [vmem:[#allocation2 + $0x48] sm:$0xff]  ;;  %v762_v40 = vpop.f32.mrf.mxu0  ;;  %v826_v41 = vpop.f32.mrf.mxu1  ;;  %v376_v15 = vld [vmem:[#allocation2 + $0xf0] sm:$0xff] }
 0x124   : > { %v1456_v32 = vpack.c.bf16 %v1029_v24, %v1029_v24  ;;  %v937_v37 = vld [vmem:[#allocation2 + $0xc8] sm:$0xff]  ;;  %v1030_v42 = vmax.f32 %v998_v34, 0.0  ;;  %v960_v44 = vmul.f32 %v1799_v62, %v921_v36  ;;  %888 = vst.msk [vmem:[#allocation2 + $0x58] sm:$0xff] %vm313_vm0, %v855_v38  ;;  %904 = vst.msk [vmem:[#allocation2 + $0xd8] sm:$0xff] %vm313_vm0, %v871_v39 }
 0x125   : > { %v1472_v33 = vpack.c.bf16 %v1045_v25, %v1045_v25  ;;  %v1046_v43 = vmax.f32 %v1014_v35, 0.0  ;;  %v976_v45 = vmul.f32 %v1799_v62, %v937_v37  ;;  %v765_v48 = vpop.f32.mrf.mxu0  ;;  %v829_v49 = vpop.f32.mrf.mxu1 }
 0x126   : > { %1190 = vst.msk [vmem:[%s1820_s28 + $0x1c] sm:$0xf] %vm1182_vm2, %v1456_v32  ;;  %v1457_v50 = vpack.c.bf16 %v1030_v42, %v1030_v42  ;;  %v999_v52 = vadd.f32 %v1804_v1, %v960_v44  ;;  %v856_v56 = vadd.f32 %v765_v48, %v358_v46  ;;  %v872_v57 = vadd.f32 %v829_v49, %v374_v47  ;;  %v361_v32 = vld [vmem:[#allocation2 + $0x78] sm:$0xff] }
 0x127   : > { %1206 = vst.msk [vmem:[%s1820_s28 + $0x5c] sm:$0xf] %vm1182_vm2, %v1472_v33  ;;  %v1473_v51 = vpack.c.bf16 %v1046_v43, %v1046_v43  ;;  %v1015_v53 = vadd.f32 %v1804_v1, %v976_v45  ;;  %v922_v54 = vld [vmem:[#allocation2 + $0x50] sm:$0xff]  ;;  %v767_v58 = vpop.f32.mrf.mxu0  ;;  %v831_v59 = vpop.f32.mrf.mxu1  ;;  %v377_v33 = vld [vmem:[#allocation2 + $0xf8] sm:$0xff] }
 0x128   : > { %v938_v55 = vld [vmem:[#allocation2 + $0xd0] sm:$0xff]  ;;  %1191 = vst.msk [vmem:[%s1820_s28 + $0x20] sm:$0xf] %vm1182_vm2, %v1457_v50  ;;  %v1031_v60 = vmax.f32 %v999_v52, 0.0  ;;  %v961_v63 = vmul.f32 %v1799_v62, %v922_v54 }
 0x129   : > { %1207 = vst.msk [vmem:[%s1820_s28 + $0x60] sm:$0xf] %vm1182_vm2, %v1473_v51  ;;  %v1047_v61 = vmax.f32 %v1015_v53, 0.0  ;;  %v977_v0 = vmul.f32 %v1799_v62, %v938_v55  ;;  %v768_v4 = vpop.f32.mrf.mxu0  ;;  %v832_v5 = vpop.f32.mrf.mxu1 }
 0x12a   : > { %889 = vst.msk [vmem:[#allocation2 + $0x60] sm:$0xff] %vm313_vm0, %v856_v56  ;;  %905 = vst.msk [vmem:[#allocation2 + $0xe0] sm:$0xff] %vm313_vm0, %v872_v57  ;;  %v1458_v6 = vpack.c.bf16 %v1031_v60, %v1031_v60  ;;  %v1000_v8 = vadd.f32 %v1804_v1, %v961_v63  ;;  %v857_v10 = vadd.f32 %v768_v4, %v359_v2 }
 0x12b   : > { %v1474_v7 = vpack.c.bf16 %v1047_v61, %v1047_v61  ;;  %v1016_v9 = vadd.f32 %v1804_v1, %v977_v0  ;;  %v873_v11 = vadd.f32 %v832_v5, %v375_v3  ;;  %v770_v12 = vpop.f32.mrf.mxu0  ;;  %v834_v13 = vpop.f32.mrf.mxu1  ;;  %v923_v18 = vld [vmem:[#allocation2 + $0x58] sm:$0xff] }
 0x12c   : > { %1192 = vst.msk [vmem:[%s1820_s28 + $0x24] sm:$0xf] %vm1182_vm2, %v1458_v6  ;;  %v1032_v16 = vmax.f32 %v1000_v8, 0.0  ;;  %v939_v19 = vld [vmem:[#allocation2 + $0xd8] sm:$0xff]  ;;  %v962_v20 = vmul.f32 %v1799_v62, %v923_v18 }
 0x12d   : > { %1208 = vst.msk [vmem:[%s1820_s28 + $0x64] sm:$0xf] %vm1182_vm2, %v1474_v7  ;;  %v1048_v17 = vmax.f32 %v1016_v9, 0.0  ;;  %v978_v21 = vmul.f32 %v1799_v62, %v939_v19  ;;  %v773_v22 = vpop.f32.mrf.mxu0  ;;  %v837_v23 = vpop.f32.mrf.mxu1 }
 0x12e   : > { %890 = vst.msk [vmem:[#allocation2 + $0x68] sm:$0xff] %vm313_vm0, %v857_v10  ;;  %906 = vst.msk [vmem:[#allocation2 + $0xe8] sm:$0xff] %vm313_vm0, %v873_v11  ;;  %v1459_v24 = vpack.c.bf16 %v1032_v16, %v1032_v16  ;;  %v858_v26 = vadd.f32 %v773_v22, %v360_v14  ;;  %v874_v27 = vadd.f32 %v837_v23, %v376_v15 }
 0x12f   : > { %v1475_v25 = vpack.c.bf16 %v1048_v17, %v1048_v17  ;;  %v1001_v28 = vadd.f32 %v1804_v1, %v962_v20  ;;  %v1017_v29 = vadd.f32 %v1804_v1, %v978_v21  ;;  %v775_v30 = vpop.f32.mrf.mxu0  ;;  %v839_v31 = vpop.f32.mrf.mxu1 }
 0x130   : > { %1193 = vst.msk [vmem:[%s1820_s28 + $0x28] sm:$0xf] %vm1182_vm2, %v1459_v24 }
 0x131   : > { %1209 = vst.msk [vmem:[%s1820_s28 + $0x68] sm:$0xf] %vm1182_vm2, %v1475_v25  ;;  %v924_v34 = vld [vmem:[#allocation2 + $0x60] sm:$0xff]  ;;  %v1033_v36 = vmax.f32 %v1001_v28, 0.0  ;;  %v1049_v37 = vmax.f32 %v1017_v29, 0.0  ;;  %v776_v40 = vpop.f32.mrf.mxu0  ;;  %v840_v41 = vpop.f32.mrf.mxu1 }
 0x132   : > { %v940_v35 = vld [vmem:[#allocation2 + $0xe0] sm:$0xff]  ;;  %891 = vst.msk [vmem:[#allocation2 + $0x70] sm:$0xff] %vm313_vm0, %v858_v26  ;;  %907 = vst.msk [vmem:[#allocation2 + $0xf0] sm:$0xff] %vm313_vm0, %v874_v27  ;;  %v963_v38 = vmul.f32 %v1799_v62, %v924_v34  ;;  %v859_v42 = vadd.f32 %v776_v40, %v361_v32  ;;  %v875_v43 = vadd.f32 %v840_v41, %v377_v33 }
 0x133   : > { %v979_v39 = vmul.f32 %v1799_v62, %v940_v35  ;;  %v1460_v44 = vpack.c.bf16 %v1033_v36, %v1033_v36  ;;  %v1476_v45 = vpack.c.bf16 %v1049_v37, %v1049_v37  ;;  %v778_v48 = vpop.f32.mrf.mxu0  ;;  %v842_v49 = vpop.f32.mrf.mxu1 }
 0x134   : > { %v1002_v46 = vadd.f32 %v1804_v1, %v963_v38  ;;  %892 = vst.msk [vmem:[#allocation2 + $0x78] sm:$0xff] %vm313_vm0, %v859_v42  ;;  %908 = vst.msk [vmem:[#allocation2 + $0xf8] sm:$0xff] %vm313_vm0, %v875_v43 }
 0x135   : > { %v1018_v47 = vadd.f32 %v1804_v1, %v979_v39  ;;  %v925_v50 = vld [vmem:[#allocation2 + $0x68] sm:$0xff]  ;;  %1194 = vst.msk [vmem:[%s1820_s28 + $0x2c] sm:$0xf] %vm1182_vm2, %v1460_v44  ;;  %1210 = vst.msk [vmem:[%s1820_s28 + $0x6c] sm:$0xf] %vm1182_vm2, %v1476_v45 }
 0x136   : > { %v941_v51 = vld [vmem:[#allocation2 + $0xe8] sm:$0xff]  ;;  %v1034_v52 = vmax.f32 %v1002_v46, 0.0  ;;  %v964_v54 = vmul.f32 %v1799_v62, %v925_v50 }
 0x137   : > { %v1050_v53 = vmax.f32 %v1018_v47, 0.0  ;;  %v980_v55 = vmul.f32 %v1799_v62, %v941_v51 }
 0x138   : > { %v1461_v56 = vpack.c.bf16 %v1034_v52, %v1034_v52  ;;  %v1003_v58 = vadd.f32 %v1804_v1, %v964_v54 }
 0x139   : > { %v1477_v57 = vpack.c.bf16 %v1050_v53, %v1050_v53  ;;  %v1019_v59 = vadd.f32 %v1804_v1, %v980_v55  ;;  %v926_v60 = vld [vmem:[#allocation2 + $0x70] sm:$0xff] }
 0x13a   : > { %v942_v61 = vld [vmem:[#allocation2 + $0xf0] sm:$0xff]  ;;  %v965_v63 = vmul.f32 %v1799_v62, %v926_v60  ;;  %1195 = vst.msk [vmem:[%s1820_s28 + $0x30] sm:$0xf] %vm1182_vm2, %v1461_v56  ;;  %v1035_v2 = vmax.f32 %v1003_v58, 0.0 }
 0x13b   : > { %v981_v0 = vmul.f32 %v1799_v62, %v942_v61  ;;  %1211 = vst.msk [vmem:[%s1820_s28 + $0x70] sm:$0xf] %vm1182_vm2, %v1477_v57  ;;  %v1051_v3 = vmax.f32 %v1019_v59, 0.0  ;;  %v927_v8 = vld [vmem:[#allocation2 + $0x78] sm:$0xff] }
 0x13c   : > { %v1004_v4 = vadd.f32 %v1804_v1, %v965_v63  ;;  %v1462_v6 = vpack.c.bf16 %v1035_v2, %v1035_v2  ;;  %v943_v9 = vld [vmem:[#allocation2 + $0xf8] sm:$0xff]  ;;  %v966_v12 = vmul.f32 %v1799_v62, %v927_v8 }
 0x13d   : > { %v1020_v5 = vadd.f32 %v1804_v1, %v981_v0  ;;  %v1478_v7 = vpack.c.bf16 %v1051_v3, %v1051_v3  ;;  %v982_v13 = vmul.f32 %v1799_v62, %v943_v9 }
 0x13e   : > { %v1036_v10 = vmax.f32 %v1004_v4, 0.0  ;;  %1196 = vst.msk [vmem:[%s1820_s28 + $0x34] sm:$0xf] %vm1182_vm2, %v1462_v6  ;;  %v1005_v16 = vadd.f32 %v1804_v1, %v966_v12 }
 0x13f   : > { %v1052_v11 = vmax.f32 %v1020_v5, 0.0  ;;  %1212 = vst.msk [vmem:[%s1820_s28 + $0x74] sm:$0xf] %vm1182_vm2, %v1478_v7  ;;  %v1021_v17 = vadd.f32 %v1804_v1, %v982_v13 }
 0x140   : > { %v1463_v14 = vpack.c.bf16 %v1036_v10, %v1036_v10  ;;  %v1037_v18 = vmax.f32 %v1005_v16, 0.0 }
 0x141   : > { %v1479_v15 = vpack.c.bf16 %v1052_v11, %v1052_v11  ;;  %v1053_v19 = vmax.f32 %v1021_v17, 0.0 }
 0x142   : > { %1197 = vst.msk [vmem:[%s1820_s28 + $0x38] sm:$0xf] %vm1182_vm2, %v1463_v14  ;;  %v1464_v20 = vpack.c.bf16 %v1037_v18, %v1037_v18 }
 0x143   : > { %1213 = vst.msk [vmem:[%s1820_s28 + $0x78] sm:$0xf] %vm1182_vm2, %v1479_v15  ;;  %v1480_v21 = vpack.c.bf16 %v1053_v19, %v1053_v19 }
 0x144   : > { %1198 = vst.msk [vmem:[%s1820_s28 + $0x3c] sm:$0xf] %vm1182_vm2, %v1464_v20 }
 0x145   : > { %1214 = vst.msk [vmem:[%s1820_s28 + $0x7c] sm:$0xf] %vm1182_vm2, %v1480_v21 }
 0x146 PF: > { %s14_s17 = sadd.s32 1, %s1607_s17   ;;  %s1982_s15 = smov %s1603_s16 }
 0x147   : > { %p11_p5 = scmp.ge.s32.totalorder %s14_s17, 10   ;;  %s1983_s16 = smov %s1985_s18 }
 0x149   :  { %13 = sbr.rel (!%p11_p5) target bundleno = 2 (0x2), region = 83 }

</bundles_post_ra>
